<compile_context>
chip_gen: v7x
topology: tpu7x:2x2x1
jax: 0.10.0
libtpu: 0.0.40
codegen_flags: <defaults>
</compile_context>

<pallas_src>
import math
import jax
import jax.numpy as jnp
from jax.experimental import pallas as pl
from jax.experimental.pallas import tpu as pltpu


def _round_up(x, m):
    return (x + m - 1) // m * m


def _vmem_capacity_bytes():
    """Best-effort physical VMEM capacity for the current chip."""
    try:
        return int(pltpu.get_tpu_info().vmem_capacity_bytes)
    except Exception:
        try:
            kind = jax.devices()[0].device_kind.lower()
        except Exception:
            kind = ""
        if any(v in kind for v in ("v4", "v5", "v6")):
            return 128 << 20
        return 64 << 20  # conservative (v7x per-TensorCore)


# --------------------------------------------------------------------------- #
# Kernels
# --------------------------------------------------------------------------- #
def _ffn_resident_kernel(x_ref, w1_ref, b1_ref, w2_ref, b2_ref, o_ref):
    # (tm, dm) @ (dm, dff) on the MXU, f32 accumulate; bias + ReLU epilogue.
    h = jnp.dot(x_ref[...], w1_ref[...], preferred_element_type=jnp.float32)
    h = jnp.maximum(h + b1_ref[...], 0.0)
    # Dropout(p=0.1) is identity at inference (model.eval()).
    y = jnp.dot(h.astype(w2_ref.dtype), w2_ref[...],
                preferred_element_type=jnp.float32)
    o_ref[...] = (y + b2_ref[...]).astype(o_ref.dtype)


def _ffn_stream_kernel(x_ref, w1_ref, b1_ref, w2_ref, b2_ref, o_ref, acc_ref):
    k = pl.program_id(1)

    @pl.when(k == 0)
    def _init():
        acc_ref[...] = jnp.zeros_like(acc_ref)

    # First matmul partial on this d_ff chunk: (tm, dm) @ (dm, tk) -> (tm, tk)
    h = jnp.dot(x_ref[...], w1_ref[...], preferred_element_type=jnp.float32)
    h = jnp.maximum(h + b1_ref[...], 0.0)       # per-chunk b1 + ReLU (exact)
    # Dropout(p=0.1) is identity at inference.
    # Second matmul partial: (tm, tk) @ (tk, dm), f32 accumulation in scratch.
    acc_ref[...] += jnp.dot(h.astype(w2_ref.dtype), w2_ref[...],
                            preferred_element_type=jnp.float32)

    @pl.when(k == pl.num_programs(1) - 1)
    def _finalize():
        o_ref[...] = (acc_ref[...] + b2_ref[...]).astype(o_ref.dtype)


# --------------------------------------------------------------------------- #
# Wrapper
# --------------------------------------------------------------------------- #
def prepare_ffn_params(w1, b1, w2, b2, compute_dtype=jnp.bfloat16):
    """One-time pad + cast of FFN weights (call once, NOT per forward pass).

    w1: (d_model, d_ff), w2: (d_ff, d_model)  -- (in_features, out_features)
    layout, i.e. transposed vs. PyTorch nn.Linear storage, so y = x @ W + b.
    Last dims are zero-padded to multiples of 128 (a mathematical no-op) and
    the weights are cast to `compute_dtype` for the MXU.
    """
    d_model, d_ff = w1.shape
    d_model_p = _round_up(d_model, 128)
    d_ff_p = _round_up(d_ff, 128)

    if (d_model_p, d_ff_p) == (d_model, d_ff):
        w1_p = w1.astype(compute_dtype)
        w2_p = w2.astype(compute_dtype)
        b1_p = b1.astype(jnp.float32).reshape(1, d_ff_p)
        b2_p = b2.astype(jnp.float32).reshape(1, d_model_p)
    else:
        w1_p = jnp.zeros((d_model_p, d_ff_p), compute_dtype)
        w1_p = w1_p.at[:d_model, :d_ff].set(w1.astype(compute_dtype))
        w2_p = jnp.zeros((d_ff_p, d_model_p), compute_dtype)
        w2_p = w2_p.at[:d_ff, :d_model].set(w2.astype(compute_dtype))
        b1_p = jnp.zeros((1, d_ff_p), jnp.float32)
        b1_p = b1_p.at[0, :d_ff].set(b1.astype(jnp.float32))
        b2_p = jnp.zeros((1, d_model_p), jnp.float32)
        b2_p = b2_p.at[0, :d_model].set(b2.astype(jnp.float32))
    return w1_p, b1_p, w2_p, b2_p


def feed_forward(x, w1_p, b1_p, w2_p, b2_p):
    """Inference-mode FeedForward. x: (B, S, d_model); returns same shape/dtype."""
    B, S, d_model = x.shape
    M = B * S
    out_dtype = x.dtype
    compute_dtype = w1_p.dtype
    c_itemsize = jnp.dtype(compute_dtype).itemsize
    o_itemsize = jnp.dtype(out_dtype).itemsize
    d_model_p, d_ff_p = w1_p.shape
    assert d_model_p == _round_up(d_model, 128), "weights not prepared for this d_model"

    # ---- chip-aware tile / VMEM-budget selection ---------------------------
    vmem_cap = _vmem_capacity_bytes()
    big_vmem = vmem_cap >= (96 << 20)             # v4/v5/v6: 128 MiB; v7x: 64 MiB
    vmem_limit = (100 << 20) if big_vmem else (48 << 20)
    budget = int(vmem_limit * 0.80)

    tm = 512 if big_vmem else 256
    tm = min(tm, _round_up(M, 16))
    if _round_up(M, tm) // tm == 1 and M > 16:
        # Megacore balance (v7x has 2 TensorCores): give each core a row block.
        tm = _round_up((M + 1) // 2, 16)
    tm = max(tm, 16)

    # Resident path estimate. Weights counted 2x in case the pipeline still
    # allocates double buffers for the constant-index blocks.
    def resident_estimate(tm_):
        return (2 * 2 * d_model_p * d_ff_p * c_itemsize   # W1 + W2 (x2 safety)
                + 2 * tm_ * d_model_p * c_itemsize        # x double-buffer
                + 2 * tm_ * d_model_p * o_itemsize        # out double-buffer
                + tm_ * d_ff_p * 4                        # f32 hidden temp
                + 2 * (d_ff_p + d_model_p) * 4)           # biases

    use_resident = resident_estimate(tm) <= budget

    # Streaming fallback: tk = largest 128-multiple divisor of d_ff_p <= cap.
    q = d_ff_p // 128
    tk_cap = 1024 if big_vmem else 512
    tk_divs = [128 * d for d in range(1, q + 1) if q % d == 0 and 128 * d <= tk_cap]
    tk = max(tk_divs)

    def stream_estimate(tm_, tk_):
        return (2 * tm_ * d_model_p * c_itemsize          # x blocks
                + 2 * d_model_p * tk_ * c_itemsize        # W1 blocks
                + 2 * tk_ * d_model_p * c_itemsize        # W2 blocks
                + 2 * tm_ * d_model_p * o_itemsize        # out blocks
                + tm_ * d_model_p * 4                     # f32 accumulator
                + tm_ * tk_ * 4                           # f32 hidden temp
                + 2 * (tk_ + d_model_p) * 4)              # biases

    if not use_resident:
        while stream_estimate(tm, tk) > budget and tk > min(tk_divs):
            tk = max(t for t in tk_divs if t < tk)
        while stream_estimate(tm, tk) > budget and tm > 16:
            tm = max(16, _round_up(tm // 2, 16))

    M_p = _round_up(M, tm)
    n_row = M_p // tm

    # ---- pad / cast x (per-call; skipped entirely when already aligned) ----
    x2d = x.reshape(M, d_model).astype(compute_dtype)
    if (M_p, d_model_p) != (M, d_model):
        x_p = jnp.zeros((M_p, d_model_p), compute_dtype)
        x_p = x_p.at[:M, :d_model].set(x2d)
    else:
        x_p = x2d

    flops = 2 * 2 * M_p * d_ff_p * d_model_p
    weight_bytes = 2 * d_model_p * d_ff_p * c_itemsize
    io_bytes = (x_p.size * c_itemsize + M_p * d_model_p * o_itemsize
                + (d_ff_p + d_model_p) * 4)

    if use_resident:
        cost = pl.CostEstimate(flops=flops, transcendentals=0,
                               bytes_accessed=weight_bytes + io_bytes)
        out = pl.pallas_call(
            _ffn_resident_kernel,
            out_shape=jax.ShapeDtypeStruct((M_p, d_model_p), out_dtype),
            grid_spec=pltpu.PrefetchScalarGridSpec(
                num_scalar_prefetch=0,
                grid=(n_row,),
                in_specs=[
                    pl.BlockSpec((tm, d_model_p), lambda i: (i, 0)),      # x rows
                    pl.BlockSpec((d_model_p, d_ff_p), lambda i: (0, 0)),  # W1 (resident)
                    pl.BlockSpec((1, d_ff_p), lambda i: (0, 0)),          # b1
                    pl.BlockSpec((d_ff_p, d_model_p), lambda i: (0, 0)),  # W2 (resident)
                    pl.BlockSpec((1, d_model_p), lambda i: (0, 0)),       # b2
                ],
                out_specs=pl.BlockSpec((tm, d_model_p), lambda i: (i, 0)),
            ),
            compiler_params=pltpu.CompilerParams(
                dimension_semantics=("parallel",),
                vmem_limit_bytes=vmem_limit,
            ),
            cost_estimate=cost,
        )(x_p, w1_p, b1_p, w2_p, b2_p)
    else:
        n_k = d_ff_p // tk
        cost = pl.CostEstimate(flops=flops, transcendentals=0,
                               bytes_accessed=n_row * weight_bytes + io_bytes)
        out = pl.pallas_call(
            _ffn_stream_kernel,
            out_shape=jax.ShapeDtypeStruct((M_p, d_model_p), out_dtype),
            grid_spec=pltpu.PrefetchScalarGridSpec(
                num_scalar_prefetch=0,
                grid=(n_row, n_k),
                in_specs=[
                    pl.BlockSpec((tm, d_model_p), lambda i, k: (i, 0)),   # x rows
                    pl.BlockSpec((d_model_p, tk), lambda i, k: (0, k)),   # W1 col block
                    pl.BlockSpec((1, tk), lambda i, k: (0, k)),           # b1 chunk
                    pl.BlockSpec((tk, d_model_p), lambda i, k: (k, 0)),   # W2 row block
                    pl.BlockSpec((1, d_model_p), lambda i, k: (0, 0)),    # b2
                ],
                out_specs=pl.BlockSpec((tm, d_model_p), lambda i, k: (i, 0)),
                scratch_shapes=[pltpu.VMEM((tm, d_model_p), jnp.float32)],
            ),
            compiler_params=pltpu.CompilerParams(
                dimension_semantics=("parallel", "arbitrary"),
                vmem_limit_bytes=vmem_limit,
            ),
            cost_estimate=cost,
        )(x_p, w1_p, b1_p, w2_p, b2_p)

    return out[:M, :d_model].reshape(B, S, d_model)


def init_params(key, d_model):
    """Deterministic init mirroring nn.Linear default (uniform +/- 1/sqrt(fan_in))."""
    d_ff = d_model + 256
    k1, k2, k3, k4 = jax.random.split(key, 4)
    bound1 = 1.0 / math.sqrt(d_model)
    bound2 = 1.0 / math.sqrt(d_ff)
    w1 = jax.random.uniform(k1, (d_model, d_ff), jnp.float32, -bound1, bound1)
    b1 = jax.random.uniform(k2, (d_ff,), jnp.float32, -bound1, bound1)
    w2 = jax.random.uniform(k3, (d_ff, d_model), jnp.float32, -bound2, bound2)
    b2 = jax.random.uniform(k4, (d_model,), jnp.float32, -bound2, bound2)
    return w1, b1, w2, b2


if __name__ == "__main__":
    key = jax.random.PRNGKey(0)
    kx, kp = jax.random.split(key)

    B, S, d_model = 2, 8, 32          # d_ff = d_model + 256 = 288
    x = jax.random.normal(kx, (B, S, d_model), jnp.float32)
    w1, b1, w2, b2 = init_params(kp, d_model)

    # One-time weight preparation (pad to 128-aligned, cast to bf16).
    w1_p, b1_p, w2_p, b2_p = prepare_ffn_params(w1, b1, w2, b2)

    fwd = jax.jit(feed_forward)
    y = jax.block_until_ready(fwd(x, w1_p, b1_p, w2_p, b2_p))
    assert y.shape == (B, S, d_model)

    # Reference with matching mixed precision (bf16 matmul inputs, f32 accum).
    bf = jnp.bfloat16
    x2d = x.reshape(-1, d_model)
    h_ref = jnp.dot(x2d.astype(bf), w1.astype(bf),
                    preferred_element_type=jnp.float32) + b1
    h_ref = jnp.maximum(h_ref, 0.0)
    y_ref = jnp.dot(h_ref.astype(bf), w2.astype(bf),
                    preferred_element_type=jnp.float32) + b2
    y_ref = y_ref.reshape(B, S, d_model).astype(x.dtype)
    assert jnp.allclose(y, y_ref, atol=2e-2, rtol=2e-2)

    # Sanity vs full-f32 math (loose tolerance due to bf16 matmul inputs).
    ref_f32 = jnp.maximum(x @ w1 + b1, 0.0) @ w2 + b2
    assert jnp.allclose(y, ref_f32, atol=8e-2, rtol=8e-2)

    print("KERNEL_OK")
</pallas_src>

<mosaic_0001>
module attributes {stable_mosaic.version = 11 : i64} {
  func.func @_ffn_resident_kernel(%arg0: i32, %arg1: memref<16x128xbf16, #tpu.memory_space<vmem>>, %arg2: memref<128x384xbf16, #tpu.memory_space<vmem>>, %arg3: memref<1x384xf32, #tpu.memory_space<vmem>>, %arg4: memref<384x128xbf16, #tpu.memory_space<vmem>>, %arg5: memref<1x128xf32, #tpu.memory_space<vmem>>, %arg6: memref<16x128xf32, #tpu.memory_space<vmem>>) attributes {dimension_semantics = [#tpu.dimension_semantics<parallel>], iteration_bounds = array<i64: 1>, scalar_prefetch = 0 : i64, scratch_operands = 0 : i64, tpu.core_type = #tpu.core_type<tc>, window_params = [{transform_indices = @transform_0, window_bounds = array<i64: 16, 128>}, {pipeline_mode = #tpu.pipeline_mode<synchronous>, transform_indices = @transform_1, window_bounds = array<i64: 128, 384>}, {pipeline_mode = #tpu.pipeline_mode<synchronous>, transform_indices = @transform_2, window_bounds = array<i64: 1, 384>}, {pipeline_mode = #tpu.pipeline_mode<synchronous>, transform_indices = @transform_3, window_bounds = array<i64: 384, 128>}, {pipeline_mode = #tpu.pipeline_mode<synchronous>, transform_indices = @transform_4, window_bounds = array<i64: 1, 128>}, {transform_indices = @transform_5, window_bounds = array<i64: 16, 128>}]} {
    %c0 = arith.constant 0 : index
    %c0_0 = arith.constant 0 : index
    %0 = vector.load %arg1[%c0, %c0_0] : memref<16x128xbf16, #tpu.memory_space<vmem>>, vector<16x128xbf16>
    %c0_1 = arith.constant 0 : index
    %c0_2 = arith.constant 0 : index
    %1 = vector.load %arg2[%c0_1, %c0_2] : memref<128x384xbf16, #tpu.memory_space<vmem>>, vector<128x384xbf16>
    %cst = arith.constant dense<0.000000e+00> : vector<16x384xf32>
    %2 = tpu.matmul %0, %1, %cst {dimension_numbers = #tpu.dot_dimension_numbers<[1], [0], [0], [1], [0, 0, 1, 1], [], []>} : vector<16x128xbf16>, vector<128x384xbf16>, vector<16x384xf32> -> vector<16x384xf32>
    %c0_3 = arith.constant 0 : index
    %c0_4 = arith.constant 0 : index
    %3 = vector.load %arg3[%c0_3, %c0_4] : memref<1x384xf32, #tpu.memory_space<vmem>>, vector<1x384xf32>
    %4 = vector.broadcast %3 : vector<1x384xf32> to vector<16x384xf32>
    %5 = arith.addf %2, %4 : vector<16x384xf32>
    %cst_5 = arith.constant 0.000000e+00 : f32
    %6 = vector.broadcast %cst_5 : f32 to vector<16x384xf32>
    %7 = arith.maximumf %5, %6 : vector<16x384xf32>
    %8 = arith.truncf %7 : vector<16x384xf32> to vector<16x384xbf16>
    %c0_6 = arith.constant 0 : index
    %c0_7 = arith.constant 0 : index
    %9 = vector.load %arg4[%c0_6, %c0_7] : memref<384x128xbf16, #tpu.memory_space<vmem>>, vector<384x128xbf16>
    %cst_8 = arith.constant dense<0.000000e+00> : vector<16x128xf32>
    %10 = tpu.matmul %8, %9, %cst_8 {dimension_numbers = #tpu.dot_dimension_numbers<[1], [0], [0], [1], [0, 0, 1, 1], [], []>} : vector<16x384xbf16>, vector<384x128xbf16>, vector<16x128xf32> -> vector<16x128xf32>
    %c0_9 = arith.constant 0 : index
    %c0_10 = arith.constant 0 : index
    %11 = vector.load %arg5[%c0_9, %c0_10] : memref<1x128xf32, #tpu.memory_space<vmem>>, vector<1x128xf32>
    %12 = vector.broadcast %11 : vector<1x128xf32> to vector<16x128xf32>
    %13 = arith.addf %10, %12 : vector<16x128xf32>
    %c0_11 = arith.constant 0 : index
    %c0_12 = arith.constant 0 : index
    %14 = vector.load %arg6[%c0_11, %c0_12] : memref<16x128xf32, #tpu.memory_space<vmem>>, vector<16x128xf32>
    tpu.vector_store %arg6[%c0_11, %c0_12], %13 {strides = array<i32>} : memref<16x128xf32, #tpu.memory_space<vmem>>, vector<16x128xf32>,
    return
  }
  func.func @transform_0(%arg0: i32) -> (i32, i32) {
    %c0_i32 = arith.constant 0 : i32
    %c0_i32_0 = arith.constant 0 : i32
    return %arg0, %c0_i32 : i32, i32
  }
  func.func @transform_1(%arg0: i32) -> (i32, i32) {
    %c0_i32 = arith.constant 0 : i32
    %c0_i32_0 = arith.constant 0 : i32
    %c0_i32_1 = arith.constant 0 : i32
    return %c0_i32, %c0_i32_0 : i32, i32
  }
  func.func @transform_2(%arg0: i32) -> (i32, i32) {
    %c0_i32 = arith.constant 0 : i32
    %c0_i32_0 = arith.constant 0 : i32
    %c0_i32_1 = arith.constant 0 : i32
    return %c0_i32, %c0_i32_0 : i32, i32
  }
  func.func @transform_3(%arg0: i32) -> (i32, i32) {
    %c0_i32 = arith.constant 0 : i32
    %c0_i32_0 = arith.constant 0 : i32
    %c0_i32_1 = arith.constant 0 : i32
    return %c0_i32, %c0_i32_0 : i32, i32
  }
  func.func @transform_4(%arg0: i32) -> (i32, i32) {
    %c0_i32 = arith.constant 0 : i32
    %c0_i32_0 = arith.constant 0 : i32
    %c0_i32_1 = arith.constant 0 : i32
    return %c0_i32, %c0_i32_0 : i32, i32
  }
  func.func @transform_5(%arg0: i32) -> (i32, i32) {
    %c0_i32 = arith.constant 0 : i32
    %c0_i32_0 = arith.constant 0 : i32
    return %arg0, %c0_i32 : i32, i32
  }
}

</mosaic_0001>

<bundles_post_ra>
// kernel: feed_forward.1
= control target key start
LH: loop header
LB: loop body
LE: loop exit
PB: predicated region body
PF: predicated region fallthrough
CT: control target
= control target key end

     0   :  { %10 = vsyncpa [#allocation3], 0  ;;  %s958_s0 = inlined_call_operand.vmem [shape: bf16[16,128], index: 0, kind: input, shape index: {}]   ;;  %s959_s1 = inlined_call_operand.hbm [shape: bf16[128,384], index: 1, kind: input, shape index: {}]   ;;  %s960_s2 = inlined_call_operand.vmem [shape: f32[1,384], index: 2, kind: input, shape index: {}]   ;;  %s961_s3 = inlined_call_operand.hbm [shape: bf16[384,128], index: 3, kind: input, shape index: {}]   ;;  %s962_s4 = inlined_call_operand.vmem [shape: f32[1,128], index: 4, kind: input, shape index: {}]   ;;  %s963_s5 = inlined_call_operand.vmem [shape: f32[16,128], index: 5, kind: output, shape index: {}]  }
   0x1   :  { %11 = vsyncpa [#allocation5], 0  ;;  %s860_s18 = smov [#allocation2]   ;;  %s812_s22 = scalar_lea.hbm %s959_s1, 3072 }
   0x2   :  { %s19_s19 = sshll.u32 %s860_s18, 4  ;;  %p813_p0 = scmp.ne.s32.totalorder %s959_s1, %s812_s22  ;;  %s20_s19 = int_to_ptr.vmem [resolvable:$true] %s19_s19 }
   0x3   :  { %p816_p1 = scmp.lt.u32.totalorder %s812_s22, %s959_s1 }
   0x5   :  { %p818_p2 = pnand %p816_p1, %p813_p0 }
   0x7   :  { %821 = shalt.err (!%p818_p2)
}
   0x8   :  { %s822_s27 = scalar_lea.vmem %s20_s19, 3072  ;;  %p827_p4 = scmp.lt.s32.totalorder %s20_s19, %s20_s19 }
   0x9   :  { %p823_p3 = scmp.ne.s32.totalorder %s20_s19, %s822_s27  ;;  %p828_p5 = scmp.lt.s32.totalorder %s822_s27, %s822_s27 }
   0xb   :  { %p829_p6 = por %p828_p5, %p827_p4 }
   0xd   :  { %p830_p7 = pnand %p829_p6, %p823_p3 }
   0xf   :  { %833 = shalt.err (!%p830_p7)
}
  0x10   :  { %s861_s28 = smov 192   ;;  %s862_s29 = smov 12  }
  0x11   :  { %25 = dma.hbm_to_vmem [thread:$0]  %s959_s1, 3072, %s20_s19, [#allocation3], %s861_s28, %s861_s28, %s862_s29  }
  0x12   :  { %s863_s7 = smov [#allocation4]   ;;  %s834_s11 = scalar_lea.hbm %s961_s3, 3072 }
  0x13   :  { %s33_s8 = sshll.u32 %s863_s7, 4  ;;  %p835_p8 = scmp.ne.s32.totalorder %s961_s3, %s834_s11  ;;  %s34_s8 = int_to_ptr.vmem [resolvable:$true] %s33_s8 }
  0x14   :  { %p838_p9 = scmp.lt.u32.totalorder %s834_s11, %s961_s3 }
  0x16   :  { %p840_p10 = pnand %p838_p9, %p835_p8 }
  0x18   :  { %843 = shalt.err (!%p840_p10)
}
  0x19   :  { %s844_s16 = scalar_lea.vmem %s34_s8, 3072  ;;  %p849_p12 = scmp.lt.s32.totalorder %s34_s8, %s34_s8 }
  0x1a   :  { %p845_p11 = scmp.ne.s32.totalorder %s34_s8, %s844_s16  ;;  %p850_p13 = scmp.lt.s32.totalorder %s844_s16, %s844_s16 }
  0x1c   :  { %p851_p0 = por %p850_p13, %p849_p12 }
  0x1e   :  { %p852_p1 = pnand %p851_p0, %p845_p11 }
  0x20   :  { %855 = shalt.err (!%p852_p1)
}
  0x21   :  { %s864_s1 = smov 64   ;;  %s865_s17 = smov 4  }
  0x22   :  { %39 = dma.hbm_to_vmem [thread:$0]  %s961_s3, 3072, %s34_s8, [#allocation5], %s864_s1, %s864_s1, %s865_s17  }
  0x23   :  { %856 = dma.done.wait [#allocation3], 3072  }
  0x24   :  { %857 = vsyncadd [#allocation3], 4294964224 }
  0x25   :  { %858 = dma.done.wait [#allocation5], 3072  }
  0x26   :  { %859 = vsyncadd [#allocation5], 4294964224  ;;  %v866_v0 = vmov 0.0   ;;  %v867_v1 = vmov 0   ;;  %vm868_vm0 = vmmov 0   ;;  %v788_v26 = vld [vmem:[#allocation4 + $0x40] sm:$0xff]   ;;  %v85_v51 = vlaneseq }
  0x27   :  { %706 = vmatprep.subr.bf16.mxu1 %v866_v0  ;;  %266 = vmatprep.mubr.bf16.mxu0 %v867_v1  ;;  %v755_v2 = vld [vmem:[#allocation2 + $0x4] ss:$12 sps:$4 sm:$0xff]   ;;  %v757_v3 = vld [vmem:[#allocation2] ss:$12 sps:$4 sm:$0xff]   ;;  %v758_v4 = vld [vmem:[#allocation2 + $0x8] ss:$12 sps:$4 sm:$0xff]  }
  0x28   :  { %722 = vmatprep.mubr.msk.bf16.mxu1 %vm868_vm0, %v866_v0  ;;  %234 = vmatprep.subr.bf16.mxu0 %v755_v2  ;;  %v759_v5 = vld [vmem:[#allocation2 + $0x1c] ss:$12 sps:$4 sm:$0xff]   ;;  %v761_v6 = vld [vmem:[#allocation2 + $0x18] ss:$12 sps:$4 sm:$0xff]   ;;  %v762_v7 = vld [vmem:[#allocation2 + $0x20] ss:$12 sps:$4 sm:$0xff]  }
  0x29   :  { %235 = vmatpush1.bf16.msra.mxu0 %v757_v3  ;;  %707 = vmatpush3.bf16.msra.mxu1 %v758_v4  ;;  %v763_v8 = vld [vmem:[#allocation2 + $0x34] ss:$12 sps:$4 sm:$0xff]   ;;  %v765_v9 = vld [vmem:[#allocation2 + $0x30] ss:$12 sps:$4 sm:$0xff]   ;;  %v766_v10 = vld [vmem:[#allocation2 + $0x38] ss:$12 sps:$4 sm:$0xff]  }
  0x2a   :  { %236 = vmatprep.subr.bf16.mxu0 %v759_v5  ;;  %708 = vmatprep.subr.bf16.mxu1 %v866_v0  ;;  %v767_v11 = vld [vmem:[#allocation2 + $0x4c] ss:$12 sps:$4 sm:$0xff]   ;;  %v769_v12 = vld [vmem:[#allocation2 + $0x48] ss:$12 sps:$4 sm:$0xff]   ;;  %v770_v13 = vld [vmem:[#allocation2 + $0x50] ss:$12 sps:$4 sm:$0xff]  }
  0x2b   :  { %v771_v14 = vld [vmem:[#allocation2 + $0x64] ss:$12 sps:$4 sm:$0xff]   ;;  %v773_v15 = vld [vmem:[#allocation2 + $0x60] ss:$12 sps:$4 sm:$0xff]   ;;  %v774_v16 = vld [vmem:[#allocation2 + $0x68] ss:$12 sps:$4 sm:$0xff]  }
  0x2c   :  { %v775_v17 = vld [vmem:[#allocation2 + $0x7c] ss:$12 sps:$4 sm:$0xff]   ;;  %v777_v18 = vld [vmem:[#allocation2 + $0x78] ss:$12 sps:$4 sm:$0xff]   ;;  %v778_v19 = vld [vmem:[#allocation2 + $0x80] ss:$12 sps:$4 sm:$0xff]  }
  0x2d   :  { %237 = vmatpush1.bf16.msra.mxu0 %v761_v6  ;;  %709 = vmatpush3.bf16.msra.mxu1 %v762_v7  ;;  %v779_v20 = vld [vmem:[#allocation2 + $0x94] ss:$12 sps:$4 sm:$0xff]   ;;  %v781_v21 = vld [vmem:[#allocation2 + $0x90] ss:$12 sps:$4 sm:$0xff]   ;;  %v782_v22 = vld [vmem:[#allocation2 + $0x98] ss:$12 sps:$4 sm:$0xff]  }
  0x2e   :  { %238 = vmatprep.subr.bf16.mxu0 %v763_v8  ;;  %710 = vmatprep.subr.bf16.mxu1 %v866_v0  ;;  %v783_v23 = vld [vmem:[#allocation2 + $0xac] ss:$12 sps:$4 sm:$0xff]   ;;  %v785_v24 = vld [vmem:[#allocation2 + $0xa8] ss:$12 sps:$4 sm:$0xff]   ;;  %v786_v25 = vld [vmem:[#allocation2 + $0xb0] ss:$12 sps:$4 sm:$0xff]  }
  0x2f   :  { %v787_v27 = vld [vmem:[%s958_s0] sm:$0xff]   ;;  %v791_v30 = vld [vmem:[#allocation4 + $0x48] sm:$0xff]   ;;  %v794_v33 = vld [vmem:[#allocation4 + $0x50] sm:$0xff]   ;;  %v86_v52 = vshrl.u32 %v85_v51, 7 }
  0x30   :  { %v789_v28 = vld [vmem:[#allocation4] sm:$0xff]   ;;  %v792_v31 = vld [vmem:[#allocation4 + $0x8] sm:$0xff]   ;;  %v795_v34 = vld [vmem:[#allocation4 + $0x10] sm:$0xff]  }
  0x31   :  { %239 = vmatpush1.bf16.msra.mxu0 %v765_v9  ;;  %711 = vmatpush3.bf16.msra.mxu1 %v766_v10  ;;  %v790_v29 = vld [vmem:[#allocation4 + $0x80] sm:$0xff]   ;;  %v793_v32 = vld [vmem:[#allocation4 + $0x88] sm:$0xff]   ;;  %v796_v35 = vld [vmem:[#allocation4 + $0x90] sm:$0xff]   ;;  %v87_v53 = vsub.s32 0, %v86_v52  ;;  %v91_v55 = vsub.s32 1, %v86_v52  ;;  %v95_v56 = vsub.s32 2, %v86_v52 }
  0x32   :  { %240 = vmatprep.subr.bf16.mxu0 %v767_v11  ;;  %712 = vmatprep.subr.bf16.mxu1 %v866_v0  ;;  %v797_v36 = vld [vmem:[#allocation4 + $0x58] sm:$0xff]   ;;  %v800_v39 = vld [vmem:[#allocation4 + $0x60] sm:$0xff]   ;;  %v803_v42 = vld [vmem:[#allocation4 + $0x68] sm:$0xff]  }
  0x33   :  { %v798_v37 = vld [vmem:[#allocation4 + $0x18] sm:$0xff]   ;;  %v801_v40 = vld [vmem:[#allocation4 + $0x20] sm:$0xff]   ;;  %v804_v43 = vld [vmem:[#allocation4 + $0x28] sm:$0xff]  }
  0x34   :  { %v799_v38 = vld [vmem:[#allocation4 + $0x98] sm:$0xff]   ;;  %v802_v41 = vld [vmem:[#allocation4 + $0xa0] sm:$0xff]   ;;  %v805_v44 = vld [vmem:[#allocation4 + $0xa8] sm:$0xff]  }
  0x35   :  { %241 = vmatpush1.bf16.msra.mxu0 %v769_v12  ;;  %713 = vmatpush3.bf16.msra.mxu1 %v770_v13  ;;  %v806_v45 = vld [vmem:[#allocation4 + $0x70] sm:$0xff]   ;;  %v809_v48 = vld [vmem:[#allocation4 + $0x78] sm:$0xff]   ;;  %v83_v54 = vld [vmem:[%s960_s2] sm:$0x7] }
  0x36   :  { %242 = vmatprep.subr.bf16.mxu0 %v771_v14  ;;  %714 = vmatprep.subr.bf16.mxu1 %v866_v0  ;;  %v807_v46 = vld [vmem:[#allocation4 + $0x30] sm:$0xff]   ;;  %v810_v49 = vld [vmem:[#allocation4 + $0x38] sm:$0xff]   ;;  %v88_v57 = vrot.slane %v83_v54, %v87_v53  ;;  %v92_v58 = vrot.slane %v83_v54, %v91_v55  ;;  %v96_v59 = vrot.slane %v83_v54, %v95_v56 }
  0x37   :  { %v808_v47 = vld [vmem:[#allocation4 + $0xb0] sm:$0xff]   ;;  %v811_v50 = vld [vmem:[#allocation4 + $0xb8] sm:$0xff]  }
  0x39   :  { %243 = vmatpush1.bf16.msra.mxu0 %v773_v15  ;;  %715 = vmatpush3.bf16.msra.mxu1 %v774_v16 }
  0x3a   :  { %244 = vmatprep.subr.bf16.mxu0 %v775_v17  ;;  %716 = vmatprep.subr.bf16.mxu1 %v866_v0 }
  0x3d   :  { %245 = vmatpush1.bf16.msra.mxu0 %v777_v18  ;;  %717 = vmatpush3.bf16.msra.mxu1 %v778_v19 }
  0x3e   :  { %246 = vmatprep.subr.bf16.mxu0 %v779_v20  ;;  %718 = vmatprep.subr.bf16.mxu1 %v866_v0 }
  0x41   :  { %247 = vmatpush1.bf16.msra.mxu0 %v781_v21  ;;  %719 = vmatpush3.bf16.msra.mxu1 %v782_v22  ;;  %v641_v22 = vld [vmem:[%s962_s4] ss:$0 sm:$0xff] }
  0x42   :  { %248 = vmatprep.subr.bf16.mxu0 %v783_v23  ;;  %720 = vmatprep.subr.bf16.mxu1 %v866_v0 }
  0x45   :  { %249 = vmatpush1.bf16.msra.mxu0 %v785_v24  ;;  %721 = vmatpush3.bf16.msra.mxu1 %v786_v25 }
  0x46   :  { %675 = vmatprep.subr.bf16.mxu0 %v788_v26  ;;  %726 = vmatprep.subr.bf16.mxu1 %v866_v0 }
  0x48   :  { %267 = vmatmul.mubr.bf16.vlgmr.msra.gmra.mrb[0].mxu0 %v787_v27  ;;  %723 = vmatmul.mubr.bf16.vlgmr.msra.gmra.mrb[0].mxu1 %v787_v27 }
  0x49   :  { %676 = vmatpush3.bf16.msra.mxu0 %v789_v28  ;;  %727 = vmatpush3.bf16.msra.mxu1 %v790_v29 }
  0x4a   :  { %677 = vmatprep.subr.bf16.mxu0 %v791_v30  ;;  %728 = vmatprep.subr.bf16.mxu1 %v866_v0 }
  0x4b   :  { %742 = vmatprep.mubr.msk.bf16.mxu1 %vm868_vm0, %v866_v0 }
  0x4d   :  { %678 = vmatpush3.bf16.msra.mxu0 %v792_v31  ;;  %729 = vmatpush3.bf16.msra.mxu1 %v793_v32 }
  0x4e   :  { %679 = vmatprep.subr.bf16.mxu0 %v794_v33  ;;  %730 = vmatprep.subr.bf16.mxu1 %v866_v0 }
  0x51   :  { %680 = vmatpush3.bf16.msra.mxu0 %v795_v34  ;;  %731 = vmatpush3.bf16.msra.mxu1 %v796_v35 }
  0x52   :  { %681 = vmatprep.subr.bf16.mxu0 %v797_v36  ;;  %732 = vmatprep.subr.bf16.mxu1 %v866_v0 }
  0x55   :  { %682 = vmatpush3.bf16.msra.mxu0 %v798_v37  ;;  %733 = vmatpush3.bf16.msra.mxu1 %v799_v38 }
  0x56   :  { %683 = vmatprep.subr.bf16.mxu0 %v800_v39  ;;  %734 = vmatprep.subr.bf16.mxu1 %v866_v0 }
  0x59   :  { %684 = vmatpush3.bf16.msra.mxu0 %v801_v40  ;;  %735 = vmatpush3.bf16.msra.mxu1 %v802_v41 }
  0x5a   :  { %685 = vmatprep.subr.bf16.mxu0 %v803_v42  ;;  %736 = vmatprep.subr.bf16.mxu1 %v866_v0 }
  0x5d   :  { %686 = vmatpush3.bf16.msra.mxu0 %v804_v43  ;;  %737 = vmatpush3.bf16.msra.mxu1 %v805_v44 }
  0x5e   :  { %738 = vmatprep.subr.bf16.mxu1 %v866_v0  ;;  %687 = vmatprep.subr.bf16.mxu0 %v806_v45 }
  0x61   :  { %688 = vmatpush3.bf16.msra.mxu0 %v807_v46  ;;  %739 = vmatpush3.bf16.msra.mxu1 %v808_v47 }
  0x62   :  { %740 = vmatprep.subr.bf16.mxu1 %v866_v0  ;;  %689 = vmatprep.subr.bf16.mxu0 %v809_v48 }
  0x65   :  { %690 = vmatpush3.bf16.msra.mxu0 %v810_v49  ;;  %741 = vmatpush3.bf16.msra.mxu1 %v811_v50 }
 0x11b   :  { %v268_v60 = vpop.f32.mrb[0].mxu0  ;;  %v311_v63 = vpop.f32.mrb[0].mxu1 }
 0x11c   :  { %v269_v61 = vadd.f32 %v268_v60, %v88_v57  ;;  %v270_v62 = vpop.f32.mrb[1].mxu0  ;;  %v312_v2 = vadd.f32 %v311_v63, %v96_v59  ;;  %v724_v3 = vpop.f32.mrb[1].mxu1 }
 0x11d   :  { %v271_v0 = vadd.f32 %v270_v62, %v92_v58  ;;  %v272_v1 = vpop.f32.mrb[2].mxu0  ;;  %v314_v6 = vpop.f32.mrb[2].mxu1 }
 0x11e   :  { %v273_v4 = vadd.f32 %v272_v1, %v88_v57  ;;  %v274_v5 = vpop.f32.mrb[3].mxu0  ;;  %v320_v7 = vmax.f32 %v312_v2, 0.0  ;;  %v315_v9 = vadd.f32 %v314_v6, %v96_v59  ;;  %v725_v10 = vpop.f32.mrb[3].mxu1  ;;  %v318_v11 = vmax.f32 %v269_v61, 0.0 }
 0x11f   :  { %v275_v8 = vadd.f32 %v274_v5, %v92_v58  ;;  %v319_v13 = vmax.f32 %v271_v0, 0.0 }
 0x120   :  { %v321_v12 = vmax.f32 %v273_v4, 0.0  ;;  %v323_v15 = vmax.f32 %v315_v9, 0.0 }
 0x121   :  { %v322_v14 = vmax.f32 %v275_v8, 0.0 }
 0x122   :  { %v324_v16 = vpack.c.bf16 %v321_v12, %v318_v11  ;;  %v326_v18 = vpack.c.bf16 %v323_v15, %v320_v7 }
 0x123   :  { %v325_v17 = vpack.c.bf16 %v322_v14, %v319_v13 }
 0x124   :  { %743 = vmatmul.mubr.bf16.vlgmr.msra.gmra.mrb[4].mxu1 %v326_v18 }
 0x125   :  { %558 = vmatprep.mubr.bf16.mxu0 %v325_v17 }
 0x126   :  { %559 = vmatmul.mubr.bf16.vlgmr.msra.gmra.mrb[4].mxu0 %v324_v16 }
 0x1f7   :  { %v601_v19 = vpop.f32.mrb[4].mxu1 }
 0x1f8   :  { %v744_v21 = vpop.f32.mrb[5].mxu1 }
 0x1f9   :  { %v691_v20 = vpop.f32.mrb[4].mxu0  ;;  %v604_v24 = vpop.f32.mrb[6].mxu1 }
 0x1fa   :  { %v692_v23 = vpop.f32.mrb[5].mxu0  ;;  %v745_v27 = vpop.f32.mrb[7].mxu1 }
 0x1fb   :  { %v693_v25 = vadd.f32 %v692_v23, %v691_v20  ;;  %v694_v26 = vpop.f32.mrb[6].mxu0 }
 0x1fc   :  { %v695_v28 = vpop.f32.mrb[7].mxu0 }
 0x1fd   :  { %v561_v29 = vadd.f32 %v693_v25, %v641_v22  ;;  %v696_v30 = vadd.f32 %v695_v28, %v694_v26 }
 0x1ff   :  { %v602_v31 = vadd.f32 %v601_v19, %v561_v29  ;;  %v564_v32 = vadd.f32 %v696_v30, %v641_v22 }
 0x201   :  { %608 = vst [vmem:[%s963_s5] sm:$0xff] %v602_v31  ;;  %v605_v33 = vadd.f32 %v604_v24, %v564_v32 }
 0x203   :  { %609 = vst [vmem:[%s963_s5 + $0x8] sm:$0xff] %v605_v33 }
 0x204   :  { %614 = vsyncpa [#allocation3], 1 }
 0x205   :  { %615 = vsyncpa [#allocation5], 1 }

</bundles_post_ra>
